<compile_context>
chip_gen: v6e
topology: v6e:2x2x1
jax: 0.10.0
libtpu: 0.0.40
codegen_flags: <defaults>
</compile_context>

<pallas_src>
import jax
import jax.numpy as jnp
from jax import lax
from jax.experimental import pallas as pl
from jax.experimental.pallas import tpu as pltpu


def _fsn_kernel(x1_ref, x2_ref, w_proj_ref, b_proj_ref, w_out_ref, b_out_ref,
                mask_ref, e_ref, out1_ref, out2_ref):
    f32 = jnp.float32
    x1 = x1_ref[...].astype(f32)                      # (T, C*V), lane-dense
    x2 = x2_ref[...].astype(f32)

    # 1x1 channel-mixing projections as plain matmuls against kron(w, I_V)
    # weights stored transposed (ic*V, C*V) -> contract lane dim of both.
    def proj(x, i):
        w = w_proj_ref[i]                             # (ic*V, C*V)
        b = b_proj_ref[i]                             # (1, ic*V)
        return lax.dot_general(x, w, (((1,), (1,)), ((), ())),
                               preferred_element_type=f32) + b

    theta = proj(x1, 0)                               # (T, ic*V)
    phi = proj(x2, 1)
    g1 = proj(x1, 2)
    g2 = proj(x2, 3)

    mask = mask_ref[...]                              # (ic*V, ic*V)
    e = e_ref[...]                                    # (ic*V, V)

    # Cross-joint correlation:
    #   logits[v, w] = sum_{k, t} theta[k, t, v] * phi[k, t, w]
    # d[a, b] = sum_t theta[t, a] phi[t, b]; mask keeps same-inner-channel
    # blocks; E folds the inner-channel axis away.  Everything is <= 32x32.
    d = lax.dot_general(theta, phi, (((0,), (0,)), ((), ())),
                        preferred_element_type=f32) * mask      # (icV, icV)
    tmp = lax.dot_general(e, d, (((0,), (0,)), ((), ())),
                          preferred_element_type=f32)           # (V, icV)
    logits = jnp.dot(tmp, e, preferred_element_type=f32)        # (V, V)

    # Column softmax (PyTorch Softmax(-2), over the first V axis).
    mx = jnp.max(logits, axis=0, keepdims=True)
    ex = jnp.exp(logits - mx)
    cor = ex * pl.reciprocal(jnp.sum(ex, axis=0, keepdims=True))  # (V, V)

    # Block-diagonal expansion of cor at (ic*V, ic*V) scale only.
    ec = jnp.dot(e, cor, preferred_element_type=f32)              # (icV, V)
    cbig = lax.dot_general(ec, e, (((1,), (1,)), ((), ())),
                           preferred_element_type=f32) * mask     # (icV, icV)

    # gamma_x1 @ cor and gamma_x2 @ cor^T, per time step, in one matmul each.
    m1 = jnp.dot(g1, cbig, preferred_element_type=f32)            # (T, icV)
    m2 = lax.dot_general(g2, cbig, (((1,), (1,)), ((), ())),
                         preferred_element_type=f32)              # (T, icV)

    # Output 1x1 convs (BN folded), identity residual, ReLU.
    y2 = jnp.dot(m1, w_out_ref[0], preferred_element_type=f32) + b_out_ref[0]
    y1 = jnp.dot(m2, w_out_ref[1], preferred_element_type=f32) + b_out_ref[1]
    out1_ref[...] = jnp.maximum(y1 + x1, 0.0).astype(out1_ref.dtype)
    out2_ref[...] = jnp.maximum(y2 + x2, 0.0).astype(out2_ref.dtype)


def unit_fsn_pallas(x1, x2, params):
    """x1, x2: (N, C, T, V) float32 (PyTorch NCHW-style). Returns (out1, out2)."""
    N, C, T, V = x1.shape
    ic = params['w_theta'].shape[0]
    CV, icV = C * V, ic * V
    f32 = jnp.float32
    eps = 1e-5

    # Fold BN (inference mode) into the output 1x1 convs.
    s1 = params['bn1_gamma'] / jnp.sqrt(params['bn1_var'] + eps)
    t1 = params['bn1_beta'] - params['bn1_mean'] * s1
    s2 = params['bn2_gamma'] / jnp.sqrt(params['bn2_var'] + eps)
    t2 = params['bn2_beta'] - params['bn2_mean'] * s2
    wc1 = params['w_conv1'] * s1[:, None]            # (C, ic)
    bc1 = params['b_conv1'] * s1 + t1                # (C,)
    wc2 = params['w_conv2'] * s2[:, None]
    bc2 = params['b_conv2'] * s2 + t2

    eye_v = jnp.eye(V, dtype=f32)

    def expand_proj(w):      # (ic, C) -> (ic*V, C*V): [kV+v', cV+v] = w[k,c] d(v,v')
        return jnp.kron(w.astype(f32), eye_v)

    def expand_out(w):       # (C, ic) -> (ic*V, C*V): [kV+v, cV+v'] = w[c,k] d(v,v')
        return jnp.kron(w.astype(f32).T, eye_v)

    # Packed constants (fetched once across the grid).
    w_proj = jnp.stack([expand_proj(params['w_theta']),
                        expand_proj(params['w_phi']),
                        expand_proj(params['w_gamma1']),
                        expand_proj(params['w_gamma2'])])          # (4, icV, CV)
    b_proj = jnp.stack([jnp.repeat(params['b_theta'].astype(f32), V)[None, :],
                        jnp.repeat(params['b_phi'].astype(f32), V)[None, :],
                        jnp.repeat(params['b_gamma1'].astype(f32), V)[None, :],
                        jnp.repeat(params['b_gamma2'].astype(f32), V)[None, :]])  # (4, 1, icV)
    w_out = jnp.stack([expand_out(wc1), expand_out(wc2)])          # (2, icV, CV)
    b_out = jnp.stack([jnp.repeat(bc1.astype(f32), V)[None, :],
                       jnp.repeat(bc2.astype(f32), V)[None, :]])   # (2, 1, CV)

    # Tiny lane-structure constants (precomputed, review item 1).
    a = jnp.arange(icV)
    mask2 = (a[:, None] // V == a[None, :] // V).astype(f32)       # (icV, icV)
    e2 = (a[:, None] % V == jnp.arange(V)[None, :]).astype(f32)    # (icV, V)

    # Lane-dense (T, C*V) slabs; last dim = C*V = 128.
    x1_c = jnp.transpose(x1, (0, 2, 1, 3)).reshape(N, T, CV)
    x2_c = jnp.transpose(x2, (0, 2, 1, 3)).reshape(N, T, CV)

    x_spec = pl.BlockSpec((None, T, CV), lambda n: (n, 0, 0))

    def const_spec(arr):
        nd = arr.ndim
        return pl.BlockSpec(arr.shape, lambda n, _nd=nd: (0,) * _nd)

    out1_c, out2_c = pl.pallas_call(
        _fsn_kernel,
        grid=(N,),
        in_specs=[x_spec, x_spec, const_spec(w_proj), const_spec(b_proj),
                  const_spec(w_out), const_spec(b_out),
                  const_spec(mask2), const_spec(e2)],
        out_specs=[x_spec, x_spec],
        out_shape=[jax.ShapeDtypeStruct((N, T, CV), x1.dtype),
                   jax.ShapeDtypeStruct((N, T, CV), x2.dtype)],
        compiler_params=pltpu.CompilerParams(
            dimension_semantics=("parallel",)),   # fills both TCs on v7x
    )(x1_c, x2_c, w_proj, b_proj, w_out, b_out, mask2, e2)

    out1 = out1_c.reshape(N, T, C, V).transpose(0, 2, 1, 3)
    out2 = out2_c.reshape(N, T, C, V).transpose(0, 2, 1, 3)
    return out1, out2


# ---------------- plain-JAX reference (mirrors the PyTorch forward) ----------------

def _conv1x1(x, w, b):
    return jnp.einsum('oc,nctv->notv', w, x) + b[None, :, None, None]


def unit_fsn_reference(x1, x2, p):
    N, C, T, V = x1.shape
    ic = p['w_theta'].shape[0]
    eps = 1e-5
    th = _conv1x1(x1, p['w_theta'], p['b_theta'])                 # (N, ic, T, V)
    ph = _conv1x1(x2, p['w_phi'], p['b_phi'])
    theta_x = jnp.transpose(th, (0, 3, 1, 2)).reshape(N, V, ic * T)
    phi_x = ph.reshape(N, ic * T, V)
    cor = jax.nn.softmax(theta_x @ phi_x, axis=-2)                # (N, V, V)
    g1 = _conv1x1(x1, p['w_gamma1'], p['b_gamma1']).reshape(N, ic * T, V)
    g2 = _conv1x1(x2, p['w_gamma2'], p['b_gamma2']).reshape(N, ic * T, V)

    def bn(x, g, b, m, v):
        inv = g / jnp.sqrt(v + eps)
        return x * inv[None, :, None, None] + (b - m * inv)[None, :, None, None]

    out2 = _conv1x1((g1 @ cor).reshape(N, ic, T, V), p['w_conv1'], p['b_conv1'])
    out2 = bn(out2, p['bn1_gamma'], p['bn1_beta'], p['bn1_mean'], p['bn1_var'])
    out1 = _conv1x1((g2 @ jnp.swapaxes(cor, 1, 2)).reshape(N, ic, T, V),
                    p['w_conv2'], p['b_conv2'])
    out1 = bn(out1, p['bn2_gamma'], p['bn2_beta'], p['bn2_mean'], p['bn2_var'])
    out1 = jax.nn.relu(out1 + x1)   # identity1(x1) == x1 (in_c == out_c)
    out2 = jax.nn.relu(out2 + x2)
    return out1, out2


def init_params(key, in_c, out_c, coff_embedding=4):
    assert in_c == out_c
    ic = out_c // coff_embedding
    ks = jax.random.split(key, 20)

    def nrm(k, shape, scale):
        return scale * jax.random.normal(k, shape, jnp.float32)

    return {
        'w_theta':  nrm(ks[0], (ic, in_c), 0.3),  'b_theta':  nrm(ks[1], (ic,), 0.1),
        'w_phi':    nrm(ks[2], (ic, in_c), 0.3),  'b_phi':    nrm(ks[3], (ic,), 0.1),
        'w_gamma1': nrm(ks[4], (ic, in_c), 0.3),  'b_gamma1': nrm(ks[5], (ic,), 0.1),
        'w_gamma2': nrm(ks[6], (ic, in_c), 0.3),  'b_gamma2': nrm(ks[7], (ic,), 0.1),
        'w_conv1':  nrm(ks[8], (out_c, ic), 0.3), 'b_conv1':  nrm(ks[9], (out_c,), 0.1),
        'w_conv2':  nrm(ks[10], (out_c, ic), 0.3), 'b_conv2': nrm(ks[11], (out_c,), 0.1),
        'bn1_gamma': 1.0 + 0.1 * jax.random.normal(ks[12], (out_c,), jnp.float32),
        'bn1_beta':  nrm(ks[13], (out_c,), 0.1),
        'bn1_mean':  nrm(ks[14], (out_c,), 0.1),
        'bn1_var':   0.5 + jnp.abs(jax.random.normal(ks[15], (out_c,), jnp.float32)),
        'bn2_gamma': 1.0 + 0.1 * jax.random.normal(ks[16], (out_c,), jnp.float32),
        'bn2_beta':  nrm(ks[17], (out_c,), 0.1),
        'bn2_mean':  nrm(ks[18], (out_c,), 0.1),
        'bn2_var':   0.5 + jnp.abs(jax.random.normal(ks[19], (out_c,), jnp.float32)),
    }


if __name__ == "__main__":
    key = jax.random.PRNGKey(0)
    k1, k2, kp = jax.random.split(key, 3)
    N, C, T, V = 2, 8, 16, 16          # in_c == out_c == 8, inner_c = 2
    x1 = jax.random.normal(k1, (N, C, T, V), jnp.float32)
    x2 = jax.random.normal(k2, (N, C, T, V), jnp.float32)
    params = init_params(kp, C, C)

    out1, out2 = unit_fsn_pallas(x1, x2, params)
    jax.block_until_ready((out1, out2))

    r1, r2 = unit_fsn_reference(x1, x2, params)
    assert out1.shape == (N, C, T, V) and out2.shape == (N, C, T, V)
    assert jnp.allclose(out1, r1, atol=2e-4, rtol=2e-4), float(jnp.max(jnp.abs(out1 - r1)))
    assert jnp.allclose(out2, r2, atol=2e-4, rtol=2e-4), float(jnp.max(jnp.abs(out2 - r2)))
    print("KERNEL_OK")
</pallas_src>

<mosaic_0001>
module attributes {stable_mosaic.version = 11 : i64} {
  func.func @_fsn_kernel(%arg0: i32, %arg1: memref<1x16x128xf32, #tpu.memory_space<vmem>>, %arg2: memref<1x16x128xf32, #tpu.memory_space<vmem>>, %arg3: memref<4x32x128xf32, #tpu.memory_space<vmem>>, %arg4: memref<4x1x32xf32, #tpu.memory_space<vmem>>, %arg5: memref<2x32x128xf32, #tpu.memory_space<vmem>>, %arg6: memref<2x1x128xf32, #tpu.memory_space<vmem>>, %arg7: memref<32x32xf32, #tpu.memory_space<vmem>>, %arg8: memref<32x16xf32, #tpu.memory_space<vmem>>, %arg9: memref<1x16x128xf32, #tpu.memory_space<vmem>>, %arg10: memref<1x16x128xf32, #tpu.memory_space<vmem>>) attributes {dimension_semantics = [#tpu.dimension_semantics<parallel>], iteration_bounds = array<i64: 2>, scalar_prefetch = 0 : i64, scratch_operands = 0 : i64, tpu.core_type = #tpu.core_type<tc>, window_params = [{transform_indices = @transform_0, window_bounds = array<i64: 1, 16, 128>}, {transform_indices = @transform_1, window_bounds = array<i64: 1, 16, 128>}, {pipeline_mode = #tpu.pipeline_mode<synchronous>, transform_indices = @transform_2, window_bounds = array<i64: 4, 32, 128>}, {pipeline_mode = #tpu.pipeline_mode<synchronous>, transform_indices = @transform_3, window_bounds = array<i64: 4, 1, 32>}, {pipeline_mode = #tpu.pipeline_mode<synchronous>, transform_indices = @transform_4, window_bounds = array<i64: 2, 32, 128>}, {pipeline_mode = #tpu.pipeline_mode<synchronous>, transform_indices = @transform_5, window_bounds = array<i64: 2, 1, 128>}, {pipeline_mode = #tpu.pipeline_mode<synchronous>, transform_indices = @transform_6, window_bounds = array<i64: 32, 32>}, {pipeline_mode = #tpu.pipeline_mode<synchronous>, transform_indices = @transform_7, window_bounds = array<i64: 32, 16>}, {transform_indices = @transform_8, window_bounds = array<i64: 1, 16, 128>}, {transform_indices = @transform_9, window_bounds = array<i64: 1, 16, 128>}]} {
    %c0 = arith.constant 0 : index
    %c0_0 = arith.constant 0 : index
    %c0_1 = arith.constant 0 : index
    %0 = vector.load %arg1[%c0, %c0_0, %c0_1] : memref<1x16x128xf32, #tpu.memory_space<vmem>>, vector<1x16x128xf32>
    %1 = vector.shape_cast %0 : vector<1x16x128xf32> to vector<16x128xf32>
    %c0_2 = arith.constant 0 : index
    %c0_3 = arith.constant 0 : index
    %c0_4 = arith.constant 0 : index
    %2 = vector.load %arg2[%c0_2, %c0_3, %c0_4] : memref<1x16x128xf32, #tpu.memory_space<vmem>>, vector<1x16x128xf32>
    %3 = vector.shape_cast %2 : vector<1x16x128xf32> to vector<16x128xf32>
    %c0_5 = arith.constant 0 : index
    %c0_6 = arith.constant 0 : index
    %c0_7 = arith.constant 0 : index
    %4 = vector.load %arg3[%c0_5, %c0_6, %c0_7] : memref<4x32x128xf32, #tpu.memory_space<vmem>>, vector<1x32x128xf32>
    %5 = vector.shape_cast %4 : vector<1x32x128xf32> to vector<32x128xf32>
    %c0_8 = arith.constant 0 : index
    %c0_9 = arith.constant 0 : index
    %c0_10 = arith.constant 0 : index
    %6 = vector.load %arg4[%c0_8, %c0_9, %c0_10] : memref<4x1x32xf32, #tpu.memory_space<vmem>>, vector<1x1x32xf32>
    %7 = vector.shape_cast %6 : vector<1x1x32xf32> to vector<1x32xf32>
    %cst = arith.constant dense<0.000000e+00> : vector<16x32xf32>
    %8 = tpu.matmul %1, %5, %cst {dimension_numbers = #tpu.dot_dimension_numbers<[1], [1], [0], [0], [0, 0, 1, 0], [], []>} : vector<16x128xf32>, vector<32x128xf32>, vector<16x32xf32> -> vector<16x32xf32>
    %9 = vector.broadcast %7 : vector<1x32xf32> to vector<16x32xf32>
    %10 = arith.addf %8, %9 : vector<16x32xf32>
    %c1 = arith.constant 1 : index
    %c0_11 = arith.constant 0 : index
    %c0_12 = arith.constant 0 : index
    %11 = vector.load %arg3[%c1, %c0_11, %c0_12] : memref<4x32x128xf32, #tpu.memory_space<vmem>>, vector<1x32x128xf32>
    %12 = vector.shape_cast %11 : vector<1x32x128xf32> to vector<32x128xf32>
    %c1_13 = arith.constant 1 : index
    %c0_14 = arith.constant 0 : index
    %c0_15 = arith.constant 0 : index
    %13 = vector.load %arg4[%c1_13, %c0_14, %c0_15] : memref<4x1x32xf32, #tpu.memory_space<vmem>>, vector<1x1x32xf32>
    %14 = vector.shape_cast %13 : vector<1x1x32xf32> to vector<1x32xf32>
    %cst_16 = arith.constant dense<0.000000e+00> : vector<16x32xf32>
    %15 = tpu.matmul %3, %12, %cst_16 {dimension_numbers = #tpu.dot_dimension_numbers<[1], [1], [0], [0], [0, 0, 1, 0], [], []>} : vector<16x128xf32>, vector<32x128xf32>, vector<16x32xf32> -> vector<16x32xf32>
    %16 = vector.broadcast %14 : vector<1x32xf32> to vector<16x32xf32>
    %17 = arith.addf %15, %16 : vector<16x32xf32>
    %c2 = arith.constant 2 : index
    %c0_17 = arith.constant 0 : index
    %c0_18 = arith.constant 0 : index
    %18 = vector.load %arg3[%c2, %c0_17, %c0_18] : memref<4x32x128xf32, #tpu.memory_space<vmem>>, vector<1x32x128xf32>
    %19 = vector.shape_cast %18 : vector<1x32x128xf32> to vector<32x128xf32>
    %c2_19 = arith.constant 2 : index
    %c0_20 = arith.constant 0 : index
    %c0_21 = arith.constant 0 : index
    %20 = vector.load %arg4[%c2_19, %c0_20, %c0_21] : memref<4x1x32xf32, #tpu.memory_space<vmem>>, vector<1x1x32xf32>
    %21 = vector.shape_cast %20 : vector<1x1x32xf32> to vector<1x32xf32>
    %cst_22 = arith.constant dense<0.000000e+00> : vector<16x32xf32>
    %22 = tpu.matmul %1, %19, %cst_22 {dimension_numbers = #tpu.dot_dimension_numbers<[1], [1], [0], [0], [0, 0, 1, 0], [], []>} : vector<16x128xf32>, vector<32x128xf32>, vector<16x32xf32> -> vector<16x32xf32>
    %23 = vector.broadcast %21 : vector<1x32xf32> to vector<16x32xf32>
    %24 = arith.addf %22, %23 : vector<16x32xf32>
    %c3 = arith.constant 3 : index
    %c0_23 = arith.constant 0 : index
    %c0_24 = arith.constant 0 : index
    %25 = vector.load %arg3[%c3, %c0_23, %c0_24] : memref<4x32x128xf32, #tpu.memory_space<vmem>>, vector<1x32x128xf32>
    %26 = vector.shape_cast %25 : vector<1x32x128xf32> to vector<32x128xf32>
    %c3_25 = arith.constant 3 : index
    %c0_26 = arith.constant 0 : index
    %c0_27 = arith.constant 0 : index
    %27 = vector.load %arg4[%c3_25, %c0_26, %c0_27] : memref<4x1x32xf32, #tpu.memory_space<vmem>>, vector<1x1x32xf32>
    %28 = vector.shape_cast %27 : vector<1x1x32xf32> to vector<1x32xf32>
    %cst_28 = arith.constant dense<0.000000e+00> : vector<16x32xf32>
    %29 = tpu.matmul %3, %26, %cst_28 {dimension_numbers = #tpu.dot_dimension_numbers<[1], [1], [0], [0], [0, 0, 1, 0], [], []>} : vector<16x128xf32>, vector<32x128xf32>, vector<16x32xf32> -> vector<16x32xf32>
    %30 = vector.broadcast %28 : vector<1x32xf32> to vector<16x32xf32>
    %31 = arith.addf %29, %30 : vector<16x32xf32>
    %c0_29 = arith.constant 0 : index
    %c0_30 = arith.constant 0 : index
    %32 = vector.load %arg7[%c0_29, %c0_30] : memref<32x32xf32, #tpu.memory_space<vmem>>, vector<32x32xf32>
    %c0_31 = arith.constant 0 : index
    %c0_32 = arith.constant 0 : index
    %33 = vector.load %arg8[%c0_31, %c0_32] : memref<32x16xf32, #tpu.memory_space<vmem>>, vector<32x16xf32>
    %cst_33 = arith.constant dense<0.000000e+00> : vector<32x32xf32>
    %34 = tpu.matmul %10, %17, %cst_33 {dimension_numbers = #tpu.dot_dimension_numbers<[0], [0], [1], [1], [0, 1, 1, 1], [], []>} : vector<16x32xf32>, vector<16x32xf32>, vector<32x32xf32> -> vector<32x32xf32>
    %35 = arith.mulf %34, %32 : vector<32x32xf32>
    %cst_34 = arith.constant dense<0.000000e+00> : vector<16x32xf32>
    %36 = tpu.matmul %33, %35, %cst_34 {dimension_numbers = #tpu.dot_dimension_numbers<[0], [0], [1], [1], [0, 1, 1, 1], [], []>} : vector<32x16xf32>, vector<32x32xf32>, vector<16x32xf32> -> vector<16x32xf32>
    %cst_35 = arith.constant dense<0.000000e+00> : vector<16x16xf32>
    %37 = tpu.matmul %36, %33, %cst_35 {dimension_numbers = #tpu.dot_dimension_numbers<[1], [0], [0], [1], [0, 0, 1, 1], [], []>} : vector<16x32xf32>, vector<32x16xf32>, vector<16x16xf32> -> vector<16x16xf32>
    %cst_36 = arith.constant dense<0xFF800000> : vector<16xf32>
    %38 = vector.multi_reduction <maximumf>, %37, %cst_36 [0] : vector<16x16xf32> to vector<16xf32>
    %39 = vector.shape_cast %38 : vector<16xf32> to vector<1x16xf32>
    %40 = vector.broadcast %39 : vector<1x16xf32> to vector<16x16xf32>
    %41 = arith.subf %37, %40 : vector<16x16xf32>
    %42 = math.exp %41 : vector<16x16xf32>
    %cst_37 = arith.constant dense<0.000000e+00> : vector<16xf32>
    %43 = vector.multi_reduction <add>, %42, %cst_37 [0] : vector<16x16xf32> to vector<16xf32>
    %44 = vector.shape_cast %43 : vector<16xf32> to vector<1x16xf32>
    %45 = tpu.reciprocal %44 : vector<1x16xf32> -> vector<1x16xf32>
    %46 = vector.broadcast %45 : vector<1x16xf32> to vector<16x16xf32>
    %47 = arith.mulf %42, %46 : vector<16x16xf32>
    %cst_38 = arith.constant dense<0.000000e+00> : vector<32x16xf32>
    %48 = tpu.matmul %33, %47, %cst_38 {dimension_numbers = #tpu.dot_dimension_numbers<[1], [0], [0], [1], [0, 0, 1, 1], [], []>} : vector<32x16xf32>, vector<16x16xf32>, vector<32x16xf32> -> vector<32x16xf32>
    %cst_39 = arith.constant dense<0.000000e+00> : vector<32x32xf32>
    %49 = tpu.matmul %48, %33, %cst_39 {dimension_numbers = #tpu.dot_dimension_numbers<[1], [1], [0], [0], [0, 0, 1, 0], [], []>} : vector<32x16xf32>, vector<32x16xf32>, vector<32x32xf32> -> vector<32x32xf32>
    %50 = arith.mulf %49, %32 : vector<32x32xf32>
    %cst_40 = arith.constant dense<0.000000e+00> : vector<16x32xf32>
    %51 = tpu.matmul %24, %50, %cst_40 {dimension_numbers = #tpu.dot_dimension_numbers<[1], [0], [0], [1], [0, 0, 1, 1], [], []>} : vector<16x32xf32>, vector<32x32xf32>, vector<16x32xf32> -> vector<16x32xf32>
    %cst_41 = arith.constant dense<0.000000e+00> : vector<16x32xf32>
    %52 = tpu.matmul %31, %50, %cst_41 {dimension_numbers = #tpu.dot_dimension_numbers<[1], [1], [0], [0], [0, 0, 1, 0], [], []>} : vector<16x32xf32>, vector<32x32xf32>, vector<16x32xf32> -> vector<16x32xf32>
    %c0_42 = arith.constant 0 : index
    %c0_43 = arith.constant 0 : index
    %c0_44 = arith.constant 0 : index
    %53 = vector.load %arg5[%c0_42, %c0_43, %c0_44] : memref<2x32x128xf32, #tpu.memory_space<vmem>>, vector<1x32x128xf32>
    %54 = vector.shape_cast %53 : vector<1x32x128xf32> to vector<32x128xf32>
    %cst_45 = arith.constant dense<0.000000e+00> : vector<16x128xf32>
    %55 = tpu.matmul %51, %54, %cst_45 {dimension_numbers = #tpu.dot_dimension_numbers<[1], [0], [0], [1], [0, 0, 1, 1], [], []>} : vector<16x32xf32>, vector<32x128xf32>, vector<16x128xf32> -> vector<16x128xf32>
    %c0_46 = arith.constant 0 : index
    %c0_47 = arith.constant 0 : index
    %c0_48 = arith.constant 0 : index
    %56 = vector.load %arg6[%c0_46, %c0_47, %c0_48] : memref<2x1x128xf32, #tpu.memory_space<vmem>>, vector<1x1x128xf32>
    %57 = vector.shape_cast %56 : vector<1x1x128xf32> to vector<1x128xf32>
    %58 = vector.broadcast %57 : vector<1x128xf32> to vector<16x128xf32>
    %59 = arith.addf %55, %58 : vector<16x128xf32>
    %c1_49 = arith.constant 1 : index
    %c0_50 = arith.constant 0 : index
    %c0_51 = arith.constant 0 : index
    %60 = vector.load %arg5[%c1_49, %c0_50, %c0_51] : memref<2x32x128xf32, #tpu.memory_space<vmem>>, vector<1x32x128xf32>
    %61 = vector.shape_cast %60 : vector<1x32x128xf32> to vector<32x128xf32>
    %cst_52 = arith.constant dense<0.000000e+00> : vector<16x128xf32>
    %62 = tpu.matmul %52, %61, %cst_52 {dimension_numbers = #tpu.dot_dimension_numbers<[1], [0], [0], [1], [0, 0, 1, 1], [], []>} : vector<16x32xf32>, vector<32x128xf32>, vector<16x128xf32> -> vector<16x128xf32>
    %c1_53 = arith.constant 1 : index
    %c0_54 = arith.constant 0 : index
    %c0_55 = arith.constant 0 : index
    %63 = vector.load %arg6[%c1_53, %c0_54, %c0_55] : memref<2x1x128xf32, #tpu.memory_space<vmem>>, vector<1x1x128xf32>
    %64 = vector.shape_cast %63 : vector<1x1x128xf32> to vector<1x128xf32>
    %65 = vector.broadcast %64 : vector<1x128xf32> to vector<16x128xf32>
    %66 = arith.addf %62, %65 : vector<16x128xf32>
    %67 = arith.addf %66, %1 : vector<16x128xf32>
    %cst_56 = arith.constant 0.000000e+00 : f32
    %68 = vector.broadcast %cst_56 : f32 to vector<16x128xf32>
    %69 = arith.maximumf %67, %68 : vector<16x128xf32>
    %c0_57 = arith.constant 0 : index
    %c0_58 = arith.constant 0 : index
    %c0_59 = arith.constant 0 : index
    %70 = vector.load %arg9[%c0_57, %c0_58, %c0_59] : memref<1x16x128xf32, #tpu.memory_space<vmem>>, vector<1x16x128xf32>
    %71 = vector.shape_cast %70 : vector<1x16x128xf32> to vector<16x128xf32>
    %72 = vector.shape_cast %69 : vector<16x128xf32> to vector<1x16x128xf32>
    tpu.vector_store %arg9[%c0_57, %c0_58, %c0_59], %72 {strides = array<i32>} : memref<1x16x128xf32, #tpu.memory_space<vmem>>, vector<1x16x128xf32>,
    %73 = arith.addf %59, %3 : vector<16x128xf32>
    %cst_60 = arith.constant 0.000000e+00 : f32
    %74 = vector.broadcast %cst_60 : f32 to vector<16x128xf32>
    %75 = arith.maximumf %73, %74 : vector<16x128xf32>
    %c0_61 = arith.constant 0 : index
    %c0_62 = arith.constant 0 : index
    %c0_63 = arith.constant 0 : index
    %76 = vector.load %arg10[%c0_61, %c0_62, %c0_63] : memref<1x16x128xf32, #tpu.memory_space<vmem>>, vector<1x16x128xf32>
    %77 = vector.shape_cast %76 : vector<1x16x128xf32> to vector<16x128xf32>
    %78 = vector.shape_cast %75 : vector<16x128xf32> to vector<1x16x128xf32>
    tpu.vector_store %arg10[%c0_61, %c0_62, %c0_63], %78 {strides = array<i32>} : memref<1x16x128xf32, #tpu.memory_space<vmem>>, vector<1x16x128xf32>,
    return
  }
  func.func @transform_0(%arg0: i32) -> (i32, i32, i32) {
    %c0_i32 = arith.constant 0 : i32
    %c0_i32_0 = arith.constant 0 : i32
    %c0_i32_1 = arith.constant 0 : i32
    return %arg0, %c0_i32, %c0_i32_0 : i32, i32, i32
  }
  func.func @transform_1(%arg0: i32) -> (i32, i32, i32) {
    %c0_i32 = arith.constant 0 : i32
    %c0_i32_0 = arith.constant 0 : i32
    %c0_i32_1 = arith.constant 0 : i32
    return %arg0, %c0_i32, %c0_i32_0 : i32, i32, i32
  }
  func.func @transform_2(%arg0: i32) -> (i32, i32, i32) {
    %c0_i32 = arith.constant 0 : i32
    %c0_i32_0 = arith.constant 0 : i32
    %c0_i32_1 = arith.constant 0 : i32
    %c0_i32_2 = arith.constant 0 : i32
    return %c0_i32, %c0_i32_0, %c0_i32_1 : i32, i32, i32
  }
  func.func @transform_3(%arg0: i32) -> (i32, i32, i32) {
    %c0_i32 = arith.constant 0 : i32
    %c0_i32_0 = arith.constant 0 : i32
    %c0_i32_1 = arith.constant 0 : i32
    %c0_i32_2 = arith.constant 0 : i32
    return %c0_i32, %c0_i32_0, %c0_i32_1 : i32, i32, i32
  }
  func.func @transform_4(%arg0: i32) -> (i32, i32, i32) {
    %c0_i32 = arith.constant 0 : i32
    %c0_i32_0 = arith.constant 0 : i32
    %c0_i32_1 = arith.constant 0 : i32
    %c0_i32_2 = arith.constant 0 : i32
    return %c0_i32, %c0_i32_0, %c0_i32_1 : i32, i32, i32
  }
  func.func @transform_5(%arg0: i32) -> (i32, i32, i32) {
    %c0_i32 = arith.constant 0 : i32
    %c0_i32_0 = arith.constant 0 : i32
    %c0_i32_1 = arith.constant 0 : i32
    %c0_i32_2 = arith.constant 0 : i32
    return %c0_i32, %c0_i32_0, %c0_i32_1 : i32, i32, i32
  }
  func.func @transform_6(%arg0: i32) -> (i32, i32) {
    %c0_i32 = arith.constant 0 : i32
    %c0_i32_0 = arith.constant 0 : i32
    %c0_i32_1 = arith.constant 0 : i32
    return %c0_i32, %c0_i32_0 : i32, i32
  }
  func.func @transform_7(%arg0: i32) -> (i32, i32) {
    %c0_i32 = arith.constant 0 : i32
    %c0_i32_0 = arith.constant 0 : i32
    %c0_i32_1 = arith.constant 0 : i32
    return %c0_i32, %c0_i32_0 : i32, i32
  }
  func.func @transform_8(%arg0: i32) -> (i32, i32, i32) {
    %c0_i32 = arith.constant 0 : i32
    %c0_i32_0 = arith.constant 0 : i32
    %c0_i32_1 = arith.constant 0 : i32
    return %arg0, %c0_i32, %c0_i32_0 : i32, i32, i32
  }
  func.func @transform_9(%arg0: i32) -> (i32, i32, i32) {
    %c0_i32 = arith.constant 0 : i32
    %c0_i32_0 = arith.constant 0 : i32
    %c0_i32_1 = arith.constant 0 : i32
    return %arg0, %c0_i32, %c0_i32_0 : i32, i32, i32
  }
}

</mosaic_0001>

<bundles_post_ra>
// kernel: tpu_custom_call.1
= control target key start
LH: loop header
LB: loop body
LE: loop exit
PB: predicated region body
PF: predicated region fallthrough
CT: control target
= control target key end

     0   :  { %s2969_s0 = inlined_call_operand.vmem [shape: f32[2,16,128], index: 0, kind: input, shape index: {}]   ;;  %s2970_s1 = inlined_call_operand.hbm [shape: f32[2,16,128], index: 1, kind: input, shape index: {}]   ;;  %s2971_s2 = inlined_call_operand.hbm [shape: f32[4,32,128], index: 2, kind: input, shape index: {}]   ;;  %s2972_s3 = inlined_call_operand.vmem [shape: f32[4,1,32], index: 3, kind: input, shape index: {}]   ;;  %s2973_s4 = inlined_call_operand.hbm [shape: f32[2,32,128], index: 4, kind: input, shape index: {}]   ;;  %s2974_s5 = inlined_call_operand.vmem [shape: f32[2,1,128], index: 5, kind: input, shape index: {}]   ;;  %s2975_s6 = inlined_call_operand.hbm [shape: f32[32,32], index: 6, kind: input, shape index: {}]   ;;  %s2976_s7 = inlined_call_operand.vmem [shape: f32[32,16], index: 7, kind: input, shape index: {}]   ;;  %s2977_s8 = inlined_call_operand.hbm [shape: f32[2,16,128], index: 8, kind: output, shape index: {0}]   ;;  %s2978_s9 = inlined_call_operand.hbm [shape: f32[2,16,128], index: 9, kind: output, shape index: {1}]  }
   0x1   :  { %2985 = sst [smem:[#allocation18_spill]] %s2971_s2 }
   0x2   :  { %2986 = sst [smem:[#allocation19_spill]] %s2973_s4 }
   0x3   :  { %2987 = sst [smem:[#allocation20_spill]] %s2975_s6 }
   0x4   :  { %15 = vsyncpa [#allocation3], 0 }
   0x5   :  { %17 = vsyncpa [#allocation3 + $0x1], 0 }
   0x6   :  { %18 = vsyncpa [#allocation6], 0 }
   0x7   :  { %19 = vsyncpa [#allocation9], 0 }
   0x8   :  { %20 = vsyncpa [#allocation4], 0 }
   0x9   :  { %22 = vsyncpa [#allocation4 + $0x1], 0 }
   0xa   :  { %23 = vsyncpa [#allocation12], 0 }
   0xb   :  { %25 = vsyncpa [#allocation12 + $0x1], 0  ;;  %s2554_s30 = smov 0   ;;  %s2556_s10 = smov 0  }
   0xc   :  { %s2558_s11 = smov 0   ;;  %s2560_s12 = smov 0  }
   0xd LB: > { %s2575_s13 = sadd.s32 4294967295, %s2492_s12   ;;  %s1895_s14 = sadd.s32 4294967294, %s2492_s12   ;;  %s2492_s12 = sphi %s2560_s12, %s3011_s12   ;;  %s2488_s11 = sphi %s2558_s11, %s3010_s11   ;;  %s2484_s10 = sphi %s2556_s10, %s3009_s10   ;;  %s2480_s30 = sphi %s2554_s30, %s3008_s30  }
   0xe   : > { %p77_p0 = scmp.ne.s32.totalorder %s2484_s10, %s2480_s30  ;;  %p2979_p1 = scmp.eq.s32.totalorder %s2575_s13, 0 }
   0xf   : > { %p227_p2 = scmp.eq.s32.totalorder %s2575_s13, 1  ;;  %p233_p3 = scmp.eq.s32.totalorder %s1895_s14, 1 }
  0x10   : > { %p2584_p4 = por %p2979_p1, %p77_p0  ;;  %p1896_p5 = scmp.ge.s32.totalorder %s2492_s12, 1 }
  0x11   : > { %p2589_p6 = por %p233_p3, %p77_p0  ;;  %p266_p7 = scmp.lt.s32.totalorder %s2492_s12, 3 }
  0x12   : > { %s2988_s15 = scalar_select %p2584_p4, 1, 0 }
  0x13   : > { %s2989_s16 = scalar_select %p2589_p6, 1, 0 }
  0x14   : > { %p2594_p8 = pnand %p1896_p5, %p266_p7  ;;  %s2494_s18 = smov [#allocation5]  }
  0x15   : > { %s278_s19 = sshll.u32 %s2494_s18, 4  ;;  %s2495_s21 = smov [#allocation7]   ;;  %s279_s19 = int_to_ptr.vmem [resolvable:$true] %s278_s19 }
  0x16   : > { %s2990_s17 = scalar_select %p2594_p8, 1, 0 }
  0x17   : > { %p2209_p9 = pneg %p2594_p8  ;;  %s294_s22 = sshll.u32 %s2495_s21, 4  ;;  %s295_s22 = int_to_ptr.vmem [resolvable:$true] %s294_s22 }
  0x18   : > { %s2496_s23 = smov [#allocation8]   ;;  %s2295_s25 = scalar_lea.vmem %s279_s19, 2048 }
  0x19   : > { %p2603_p11 = pnand %p2209_p9, %p2979_p1  ;;  %s310_s24 = sshll.u32 %s2496_s23, 4  ;;  %s311_s24 = int_to_ptr.vmem [resolvable:$true] %s310_s24 }
  0x1a   : > { %p2296_p13 = scmp.ne.s32.totalorder %s279_s19, %s2295_s25  ;;  %p2303_p5 = scmp.lt.s32.totalorder %s279_s19, %s279_s19 }
  0x1b   : > { %p2286_p12 = pneg %p2603_p11  ;;  %p2304_p7 = scmp.lt.s32.totalorder %s2295_s25, %s2295_s25 }
  0x1d   : > { %p2298_p0 = pnand %p2296_p13, %p2286_p12  ;;  %p2305_p9 = por %p2304_p7, %p2303_p5 }
  0x1f   : > { %p2299_p3 = pneg %p2298_p0 }
  0x21   : > { %p2306_p10 = pnand %p2305_p9, %p2299_p3 }
  0x23   : > { %2309 = shalt.err (!%p2306_p10)
}
  0x24   : > { %s2980_s26 = smov 128   ;;  %s2981_s27 = smov 8  }
  0x25   : > { %s2992_s2 = sld [smem:[#allocation18_spill]]  ;;  %s2321_s14 = scalar_lea.vmem %s295_s22, 1024 }
  0x26   : > { %p2322_p13 = scmp.ne.s32.totalorder %s295_s22, %s2321_s14  ;;  %p2329_p3 = scmp.lt.s32.totalorder %s295_s22, %s295_s22 }
  0x27   : > { %p2330_p10 = scmp.lt.s32.totalorder %s2321_s14, %s2321_s14 }
  0x28   : > { %p2324_p0 = pnand %p2322_p13, %p2286_p12 }
  0x29   : > { %p2331_p7 = por %p2330_p10, %p2329_p3 }
  0x2a   : > { %p2325_p5 = pneg %p2324_p0 }
  0x2b   : > { %2212 = dma.hbm_to_vmem [thread:$0]  (!%p2603_p11), %s2992_s2, 2048, %s279_s19, [#allocation6], %s2980_s26, %s2980_s26, %s2981_s27  }
  0x2c   : > { %p2332_p9 = pnand %p2331_p7, %p2325_p5 }
  0x2e   : > { %2335 = shalt.err (!%p2332_p9)
}
  0x2f   : > { %s2993_s4 = sld [smem:[#allocation19_spill]]  ;;  %s2347_s19 = scalar_lea.vmem %s311_s24, 512 }
  0x30   : > { %p2348_p1 = scmp.ne.s32.totalorder %s311_s24, %s2347_s19  ;;  %p2355_p3 = scmp.lt.s32.totalorder %s311_s24, %s311_s24 }
  0x31   : > { %p2356_p5 = scmp.lt.s32.totalorder %s2347_s19, %s2347_s19 }
  0x32   : > { %p2350_p13 = pnand %p2348_p1, %p2286_p12 }
  0x33   : > { %p2357_p10 = por %p2356_p5, %p2355_p3 }
  0x34   : > { %p2351_p0 = pneg %p2350_p13 }
  0x35   : > { %2215 = dma.hbm_to_vmem [thread:$0]  (!%p2603_p11), %s2993_s4, 1024, %s295_s22, [#allocation6], %s2980_s26, %s2980_s26, %s2981_s27  }
  0x36   : > { %p2358_p7 = pnand %p2357_p10, %p2351_p0 }
  0x38   : > { %2361 = shalt.err (!%p2358_p7)
}
  0x39   : > { %s2994_s6 = sld [smem:[#allocation20_spill]]  ;;  %s2643_s22 = sadd.s32 1, %s2492_s12  }
  0x3a   : > { %s61_s20 = ssub.s32 %s2492_s12, %s2643_s22  ;;  %s64_s28 = sadd.s32 1, %s2488_s11 }
  0x3b   : > { %p62_p1 = scmp.eq.s32.totalorder %s61_s20, 0  ;;  %p71_p12 = scmp.ne.s32.totalorder %s2488_s11, %s2484_s10 }
  0x3c   : > { %p72_p9 = scmp.eq.s32.totalorder %s2492_s12, 0  ;;  %p2233_p13 = scmp.lt.s32.totalorder %s2492_s12, 2 }
  0x3d   : > { %s2653_s29 = scalar_select %p62_p1, %s2488_s11, %s64_s28  }
  0x3e   : > { %p73_p0 = por %p72_p9, %p71_p12  ;;  %p2657_p3 = por %p227_p2, %p71_p12 }
  0x3f   : > { %2218 = dma.hbm_to_vmem [thread:$0]  (!%p2603_p11), %s2994_s6, 512, %s311_s24, [#allocation9], %s2980_s26, %s2980_s26, %s2981_s27  }
  0x40   : > { %s2995_s14 = scalar_select %p2657_p3, 1, 0 }
  0x41   : > { %s335_s18 = sand.u32 1, %s2488_s11   ;;  %s1963_s21 = sshll.u32 %s2492_s12, 8 }
  0x42   : > { %s1901_s24 = sshll.u32 %s335_s18, 4  ;;  %s2666_s25 = scalar_lea.hbm %s2970_s1, %s1963_s21 }
  0x43   : > { %s339_s20 = scalar_lea.vmem [#allocation2], %s1901_s24  ;;  %p2668_p11 = pnand %p2233_p13, %p73_p0 }
  0x44   : > { %s346_s28 = sshll.u32 %s339_s20, 4  ;;  %s2674_s27 = scalar_lea.sflag [#allocation3], %s335_s18  ;;  %s2672_s28 = int_to_ptr.vmem [resolvable:$true] %s346_s28 }
  0x45   : > { %s2362_s2 = scalar_lea.hbm %s2666_s25, 256  ;;  %p2364_p5 = pneg %p2668_p11 }
  0x46   : > { %p2363_p2 = scmp.ne.s32.totalorder %s2666_s25, %s2362_s2  ;;  %s2367_s24 = scalar_lea.hbm %s2970_s1, 512 }
  0x47   : > { %p2368_p1 = scmp.lt.s32.totalorder %s2666_s25, %s2970_s1  ;;  %p2369_p12 = scmp.lt.s32.totalorder %s2367_s24, %s2362_s2 }
  0x48   : > { %p2365_p10 = pnand %p2364_p5, %p2363_p2 }
  0x49   : > { %p2370_p9 = por %p2369_p12, %p2368_p1 }
  0x4a   : > { %p2366_p7 = pneg %p2365_p10 }
  0x4c   : > { %p2371_p13 = pnand %p2370_p9, %p2366_p7 }
  0x4e   : > { %2374 = shalt.err (!%p2371_p13)
}
  0x4f   : > { %s2375_s18 = scalar_lea.vmem %s2672_s28, 256  ;;  %s2499_s4 = smov [#allocation2]  }
  0x50   : > { %p2376_p0 = scmp.ne.s32.totalorder %s2672_s28, %s2375_s18  ;;  %s2380_s6 = sshll.u32 %s2499_s4, 4  ;;  %s2381_s6 = int_to_ptr.vmem [resolvable:$false] %s2380_s6 }
  0x51   : > { %s2382_s21 = scalar_lea.vmem %s2381_s6, 512  ;;  %p2383_p10 = scmp.lt.s32.totalorder %s2672_s28, %s2381_s6 }
  0x52   : > { %p2378_p6 = pnand %p2376_p0, %p2364_p5  ;;  %p2384_p3 = scmp.lt.s32.totalorder %s2382_s21, %s2375_s18 }
  0x54   : > { %p2379_p2 = pneg %p2378_p6  ;;  %p2385_p4 = por %p2384_p3, %p2383_p10 }
  0x56   : > { %p2386_p8 = pnand %p2385_p4, %p2379_p2 }
  0x58   : > { %2389 = shalt.err (!%p2386_p8)
}
  0x59   : > { %s2997_s2 = smov 8   ;;  %s2998_s19 = smov 128  }
  0x5a   : > { %2222 = dma.hbm_to_vmem [thread:$0]  (!%p2668_p11), %s2666_s25, 256, %s2672_s28, %s2674_s27, %s2998_s19, %s2998_s19, %s2997_s2  }
  0x5b   : > { %p2999_p6 = scmp.ne.s32.totalorder %s2990_s17, 0 }
  0x5c   : > { %s2701_s4 = sand.u32 (!%p2999_p6), 1, %s2484_s10   ;;  %p3000_p4 = scmp.ne.s32.totalorder (!%p2999_p6), %s2988_s15, 0 }
  0x5d   : > { %358 = sbr.rel (%p2999_p6) target bundleno = 1957 (0x7a5), region = 52  ;;  %s2704_s6 = sshll.u32 (!%p2999_p6), %s2701_s4, 4 }
  0x5e   : > { %s361_s26 = scalar_lea.sflag (!%p2999_p6), [#allocation3], %s2701_s4  ;;  %s364_s24 = scalar_lea.vmem (!%p2999_p6), [#allocation2], %s2704_s6 }
  0x62   : > { %2459 = dma.done.wait (%p3000_p4), %s361_s26, 256  }
  0x63   : > { %2461 = vsyncadd (%p3000_p4), %s361_s26, 4294967040  ;;  %p3001_p8 = scmp.eq.s32.totalorder %s2575_s13, 0 }
  0x65   : > { %2463 = dma.done.wait (%p3001_p8), [#allocation6], 3072   ;;  %p3002_p3 = pmov %p3001_p8 }
  0x67   : > { %2465 = vsyncadd (%p3002_p3), [#allocation6], 4294964224  ;;  %p3003_p11 = pmov %p3002_p3 }
  0x68   : > { %p3004_p5 = pmov %p3002_p3 }
  0x69   : > { %2467 = dma.done.wait (%p3003_p11), [#allocation9], 512  }
  0x6a   : > { %2469 = vsyncadd (%p3004_p5), [#allocation9], 4294966784  ;;  %p421_p7 = scmp.lt.s32.totalorder %s2575_s13, 1  ;;  %v433_v0 = vld [vmem:[#allocation5 + $0x18] sm:$0xff]  ;;  %v432_v1 = vld [vmem:[#allocation5 + $0x10] sm:$0xff]  ;;  %vm820_vm0 = vcmask 130048  }
  0x6b   : > { %2047 = vmatprep.subr.mxu0 %v433_v0  ;;  %v520_v3 = vld [vmem:[#allocation5 + $0x38] sm:$0xff]  ;;  %v519_v4 = vld [vmem:[#allocation5 + $0x30] sm:$0xff]  ;;  %v431_v6 = vld [vmem:[#allocation5 + $0x8] sm:$0xff]  ;;  %vm954_vm1 = vcmask 261120   ;;  %s420_s19 = scalar_lea.vmem [#allocation11], %s2704_s6  ;;  %s1720_s25 = scalar_lea.sflag [#allocation12], %s2701_s4 }
  0x6c   : > { %s422_s17 = scalar_select %p421_p7, %s2575_s13, 1  ;;  %2048 = vmatpush3.xpose.msra.mxu0 %v433_v0  ;;  %2058 = vmatprep.subr.mxu1 %v520_v3  ;;  %v2730_v5 = vld [vmem:[%s364_s24] sm:$0xff]  ;;  %v518_v7 = vld [vmem:[#allocation5 + $0x28] sm:$0xff]  ;;  %v696_v12 = vld [vmem:[#allocation5 + $0x78] sm:$0xff] }
  0x6d   : > { %2049 = vmatprep.subr.mxu0 %v432_v1  ;;  %2059 = vmatpush3.xpose.msra.mxu1 %v520_v3  ;;  %v430_v8 = vld [vmem:[#allocation5] sm:$0xff]  ;;  %v2737_v11 = vld [vmem:[%s364_s24 + $0x8] sm:$0xff]  ;;  %v695_v13 = vld [vmem:[#allocation5 + $0x70] sm:$0xff]  ;;  %s1749_s26 = sshll.u32 %s420_s19, 4  ;;  %s1965_s24 = sshll.u32 %s2575_s13, 8  ;;  %s2876_s26 = int_to_ptr.vmem [resolvable:$true] %s1749_s26 }
  0x6e   : > { %s1964_s27 = sshll.u32 %s422_s17, 4  ;;  %2066 = vmatprep.mubr.f32.mxu1 %v2730_v5  ;;  %2060 = vmatprep.subr.mxu1 %v519_v4  ;;  %v517_v9 = vld [vmem:[#allocation5 + $0x20] sm:$0xff]  ;;  %v694_v14 = vld [vmem:[#allocation5 + $0x68] sm:$0xff]  ;;  %v2765_v28 = vld [vmem:[%s2976_s7 + $0x10] sm:$0xff]  ;;  %s2884_s15 = scalar_lea.hbm %s2978_s9, %s1965_s24 }
  0x6f   : > { %s425_s28 = scalar_lea.vmem %s2969_s0, %s1964_s27  ;;  %v693_v15 = vld [vmem:[#allocation5 + $0x60] sm:$0xff]  ;;  %v2759_v27 = vld [vmem:[%s2976_s7 + $0x8] sm:$0xff]  ;;  %v2771_v29 = vld [vmem:[%s2976_s7 + $0x18] sm:$0xff]  ;;  %p3005_p12 = scmp.ne.s32.totalorder %s2995_s14, 0 }
  0x70   : > { %v2725_v2 = vld [vmem:[%s425_s28] sm:$0xff]  ;;  %2050 = vmatpush3.xpose.msra.mxu0 %v432_v1  ;;  %v2733_v10 = vld [vmem:[%s425_s28 + $0x8] sm:$0xff]  ;;  %v608_v35 = vld [vmem:[#allocation5 + $0x58] sm:$0xff]  ;;  %s2390_s28 = scalar_lea.vmem %s2876_s26, 256  ;;  %s2500_s23 = smov [#allocation11]  }
  0x71   : > { %2055 = vmatprep.mubr.f32.mxu0 %v2725_v2  ;;  %2051 = vmatprep.subr.mxu0 %v431_v6  ;;  %v1915_v17 = vld [vmem:[%s2972_s3 + $0x1] ss:$0 sm:$0xff]  ;;  %v1913_v18 = vld [vmem:[%s2972_s3] ss:$0 sm:$0xff]  ;;  %v607_v36 = vld [vmem:[#allocation5 + $0x50] sm:$0xff]  ;;  %p2391_p1 = scmp.ne.s32.totalorder %s2876_s26, %s2390_s28  ;;  %s2394_s20 = sshll.u32 %s2500_s23, 4  ;;  %s2395_s20 = int_to_ptr.vmem [resolvable:$false] %s2394_s20 }
  0x72   : > { %2061 = vmatpush3.xpose.msra.mxu1 %v519_v4  ;;  %v2753_v26 = vld [vmem:[%s2976_s7] sm:$0xff]  ;;  %v606_v37 = vld [vmem:[#allocation5 + $0x48] sm:$0xff]  ;;  %v2794_v43 = vld [vmem:[#allocation8 + $0x18] sm:$0xff]  ;;  %s2396_s18 = scalar_lea.vmem %s2395_s20, 512  ;;  %p2397_p0 = scmp.lt.s32.totalorder %s2876_s26, %s2395_s20 }
  0x73   : > { %2062 = vmatprep.subr.mxu1 %v518_v7  ;;  %922 = vxpose.xlu1.b32.start [1/4] (short) (narrow) %v2753_v26, 16  ;;  %v605_v38 = vld [vmem:[#allocation5 + $0x40] sm:$0xff]  ;;  %v2796_v45 = vld [vmem:[#allocation8 + $0x10] sm:$0xff]  ;;  %v2799_v47 = vld [vmem:[#allocation8 + $0x8] sm:$0xff]  ;;  %p2392_p9 = pnand %p2391_p1, %p3005_p12  ;;  %p2398_p2 = scmp.lt.s32.totalorder %s2396_s18, %s2390_s28 }
  0x74   : > { %2052 = vmatpush3.xpose.msra.mxu0 %v431_v6  ;;  %v2802_v50 = vld [vmem:[#allocation8] sm:$0xff] }
  0x75   : > { %2053 = vmatprep.subr.mxu0 %v430_v8  ;;  %v1917_v54 = vld [vmem:[%s2972_s3 + $0x2] ss:$0 sm:$0xff]  ;;  %p2393_p13 = pneg %p2392_p9  ;;  %p2399_p10 = por %p2398_p2, %p2397_p0 }
  0x76   : > { %2063 = vmatpush3.xpose.msra.mxu1 %v518_v7 }
  0x77   : > { %2064 = vmatprep.subr.mxu1 %v517_v9  ;;  %923 = vxpose.xlu1.b32.cont [2/4] (short) (narrow) %v2759_v27, 16  ;;  %p2400_p6 = pnand %p2399_p10, %p2393_p13 }
  0x78   : > { %2054 = vmatpush3.xpose.msra.mxu0 %v430_v8 }
  0x79   : > { %2069 = vmatprep.subr.mxu0 %v608_v35 }
  0x7a   : > { %2065 = vmatpush3.xpose.msra.mxu1 %v517_v9 }
  0x7b   : > { %2056 = vmatmul.mubr.f32.vlgmr.msra.gmra.mxu0 %v2733_v10  ;;  %2080 = vmatprep.subr.mxu1 %v696_v12 }
  0x7c   : > { %2077 = vmatprep.mubr.f32.mxu0 %v2725_v2  ;;  %924 = vxpose.xlu1.b32.cont [3/4] (short) (narrow) %v2765_v28, 16 }
  0x7d   : > { %2067 = vmatmul.mubr.f32.vlgmr.msra.gmra.mxu1 %v2737_v11  ;;  %2070 = vmatpush3.xpose.msra.mxu0 %v608_v35 }
  0x7e   : > { %2088 = vmatprep.mubr.f32.mxu1 %v2730_v5  ;;  %2081 = vmatpush3.xpose.msra.mxu1 %v696_v12 }
  0x7f   : > { %2082 = vmatprep.subr.mxu1 %v695_v13  ;;  %2071 = vmatprep.subr.mxu0 %v607_v36 }
  0x80   : > { %925 = vxpose.xlu1.b32.end [4/4] (short) (narrow) %v2771_v29, 16 }
  0x81   : > { %2072 = vmatpush3.xpose.msra.mxu0 %v607_v36 }
  0x82   : > { %2083 = vmatpush3.xpose.msra.mxu1 %v695_v13  ;;  %2073 = vmatprep.subr.mxu0 %v606_v37 }
  0x83   : > { %2084 = vmatprep.subr.mxu1 %v694_v14 }
  0x85   : > { %2074 = vmatpush3.xpose.msra.mxu0 %v606_v37 }
  0x86   : > { %2085 = vmatpush3.xpose.msra.mxu1 %v694_v14  ;;  %2075 = vmatprep.subr.mxu0 %v605_v38 }
  0x87   : > { %2086 = vmatprep.subr.mxu1 %v693_v15 }
  0x89   : > { %2076 = vmatpush3.xpose.msra.mxu0 %v605_v38 }
  0x8a   : > { %2087 = vmatpush3.xpose.msra.mxu1 %v693_v15  ;;  %2112 = vmatprep.subr.mxu0 %v2771_v29 }
  0x8c   : > { %2078 = vmatmul.mubr.f32.vlgmr.msra.gmra.mxu0 %v2733_v10 }
  0x8d   : > { %2089 = vmatmul.mubr.f32.vlgmr.msra.gmra.mxu1 %v2737_v11  ;;  %2113 = vmatpush3.msra.mxu0 %v2771_v29 }
  0x8e   : > { %2114 = vmatprep.subr.mxu0 %v2765_v28 }
  0x8f   : > { %2115 = vmatpush3.msra.mxu0 %v2765_v28 }
  0x90   : > { %2116 = vmatprep.subr.mxu0 %v2759_v27 }
  0x91   : > { %2117 = vmatpush3.msra.mxu0 %v2759_v27 }
  0x92   : > { %2118 = vmatprep.subr.mxu0 %v2753_v26 }
  0x93   : > { %2119 = vmatpush3.msra.mxu0 %v2753_v26 }
  0x94   : > { %2133 = vmatprep.subr.msk.mxu0 %vm820_vm0, %v2771_v29 }
  0xf0   : > { %v938_v34 = vpop.trf.xlu1 }
  0xf4   : > { %v939_v53 = vpop.trf.xlu1 }
 0x13b   : > { %v2057_v16 = vpop.f32.mrf.mxu0 }
 0x13c   : > { %v513_v25 = vadd.f32 %v2057_v16, %v1913_v18 }
 0x13d   : > { %v507_v19 = vpop.f32.mrf.mxu0  ;;  %v2068_v20 = vpop.f32.mrf.mxu1 }
 0x13e   : > { %v508_v21 = vadd.f32 %v1913_v18, %v507_v19  ;;  %v601_v22 = vadd.f32 %v2068_v20, %v1915_v17 }
 0x13f   : > { %v595_v23 = vpop.f32.mrf.mxu1 }
 0x140   : > { %788 = vxpose.xlu0.b32.start [1/2] (short) (narrow) %v508_v21, 32  ;;  %v596_v24 = vadd.f32 %v1915_v17, %v595_v23  ;;  %2091 = vmatprep.subr.mxu1 %v601_v22 }
 0x141   : > { %2092 = vmatpush3.msra.mxu1 %v601_v22 }
 0x142   : > { %2093 = vmatprep.subr.mxu1 %v596_v24 }
 0x143   : > { %2094 = vmatpush3.msra.mxu1 %v596_v24 }
 0x144   : > { %789 = vxpose.xlu0.b32.end [2/2] (short) (narrow) %v513_v25, 32 }
 0x14c   : > { %v2079_v55 = vpop.f32.mrf.mxu0 }
 0x14d   : > { %v2790_v39 = vpop.f32.mrf.mxu1  ;;  %v2812_v56 = vadd.f32 %v2079_v55, %v1917_v54 }
 0x14e   : > { %v683_v59 = vpop.f32.mrf.mxu0 }
 0x14f   : > { %v2792_v40 = vpop.f32.mrf.mxu1 }
 0x1bc   : > { %v804_v30 = vpop.trf.xlu0 }
 0x1bd   : > { %2095 = vmatprep.mubr.msk.f32.mxu1 %vm820_vm0, %v804_v30 }
 0x1c0   : > { %v805_v31 = vpop.trf.xlu0 }
 0x1c1   : > { %2096 = vmatmul.mubr.msk.f32.vlgmr.msra.gmra.mxu1 %vm820_vm0, %v805_v31 }
 0x1c4   : > { %v806_v32 = vpop.trf.xlu0 }
 0x1c5   : > { %2098 = vmatprep.mubr.msk.f32.mxu1 %vm820_vm0, %v806_v32  ;;  %v684_v32 = vadd.f32 %v1917_v54, %v683_v59  ;;  %v1609_v54 = vld [vmem:[#allocation7 + $0x20] sm:$0xff] }
 0x1c8   : > { %v807_v33 = vpop.trf.xlu0 }
 0x1c9   : > { %2099 = vmatmul.mubr.msk.f32.gmra.mxu1 %vm820_vm0, %v807_v33 }
 0x1ca   : > { %2109 = vmatprep.mubr.msk.f32.mxu1 %vm954_vm1, %v938_v34 }
 0x281   : > { %v2097_v41 = vpop.f32.mrf.mxu1 }
 0x282   : > { %v919_v51 = vmul.f32 %v2097_v41, %v2799_v47 }
 0x283   : > { %v899_v42 = vpop.f32.mrf.mxu1 }
 0x284   : > { %v918_v52 = vmul.f32 %v899_v42, %v2802_v50 }
 0x289   : > { %v2100_v44 = vpop.f32.mrf.mxu1 }
 0x28a   : > { %v921_v46 = vmul.f32 %v2100_v44, %v2794_v43 }
 0x28b   : > { %v909_v48 = vpop.f32.mrf.mxu1 }
 0x28c   : > { %v920_v49 = vmul.f32 %v909_v48, %v2796_v45  ;;  %2101 = vmatprep.subr.mxu1 %v921_v46  ;;  %v1919_v48 = vld [vmem:[%s2972_s3 + $0x3] ss:$0 sm:$0xff] }
 0x28d   : > { %2102 = vmatpush3.msra.mxu1 %v921_v46 }
 0x28e   : > { %2103 = vmatprep.subr.mxu1 %v920_v49 }
 0x28f   : > { %2104 = vmatpush3.msra.mxu1 %v920_v49 }
 0x290   : > { %2105 = vmatprep.subr.mxu1 %v919_v51 }
 0x291   : > { %2106 = vmatpush3.msra.mxu1 %v919_v51 }
 0x292   : > { %2107 = vmatprep.subr.mxu1 %v918_v52 }
 0x293   : > { %2108 = vmatpush3.msra.mxu1 %v918_v52 }
 0x294   : > { %2110 = vmatmul.mubr.msk.f32.vlgmr.msra.gmra.mxu1 %vm954_vm1, %v939_v53  ;;  %v1611_v53 = vld [vmem:[#allocation7 + $0x30] sm:$0xff] }
 0x295   : > { %2127 = vmatprep.mubr.msk.f32.mxu1 %vm820_vm0, %v2753_v26 }
 0x354   : > { %v2111_v57 = vpop.f32.mrf.mxu1 }
 0x356   : > { %v1027_v58 = vpop.f32.mrf.mxu1 }
 0x357   : > { %2120 = vmatprep.mubr.msk.f32.mxu0 %vm954_vm1, %v1027_v58 }
 0x358   : > { %2121 = vmatmul.mubr.msk.f32.vlgmr.msra.gmra.mxu0 %vm954_vm1, %v2111_v57  ;;  %v1948_v57 = vld [vmem:[%s2974_s5] ss:$0 sm:$0xff] }
 0x359   : > { %2134 = vmatpush3.xpose.msk.msra.mxu0 %vm820_vm0, %v2771_v29 }
 0x35a   : > { %2135 = vmatprep.subr.msk.mxu0 %vm820_vm0, %v2765_v28 }
 0x35d   : > { %2136 = vmatpush3.xpose.msk.msra.mxu0 %vm820_vm0, %v2765_v28 }
 0x35e   : > { %2137 = vmatprep.subr.msk.mxu0 %vm820_vm0, %v2759_v27 }
 0x361   : > { %2138 = vmatpush3.xpose.msk.msra.mxu0 %vm820_vm0, %v2759_v27 }
 0x362   : > { %2139 = vmatprep.subr.msk.mxu0 %vm820_vm0, %v2753_v26 }
 0x365   : > { %2140 = vmatpush3.xpose.msk.msra.mxu0 %vm820_vm0, %v2753_v26 }
 0x418   : > { %v2122_v60 = vpop.f32.mrf.mxu0 }
 0x419   : > { %v1118_v62 = vsel %vm820_vm0, %v2122_v60, -inf }
 0x41a   : > { %v1108_v61 = vpop.f32.mrf.mxu0 }
 0x41b   : > { %v1117_v63 = vsel %vm820_vm0, %v1108_v61, -inf }
 0x41c   : > { %v1119_v0 = vmax.f32 %v1117_v63, %v1118_v62 }
 0x41e   : > { %v1120_v1 = vrot.slane %v1119_v0, 4 }
 0x420   : > { %v1121_v3 = vmax.f32 %v1119_v0, %v1120_v1 }
 0x422   : > { %v1122_v4 = vrot.slane %v1121_v3, 2 }
 0x424   : > { %v1123_v6 = vmax.f32 %v1121_v3, %v1122_v4 }
 0x426   : > { %v1124_v7 = vrot.slane %v1123_v6, 1 }
 0x428   : > { %v1125_v8 = vmax.f32 %v1123_v6, %v1124_v7 }
 0x42a   : > { %v1126_v9 = vsub.f32 %v1108_v61, %v1125_v8  ;;  %v1127_v12 = vsub.f32 %v2122_v60, %v1125_v8 }
 0x42c   : > { %v1128_v13 = vmul.f32 1.442695, %v1126_v9  ;;  %v1130_v14 = vmul.f32 1.442695, %v1127_v12 }
 0x42e   : > { %2278 = vpow2.f32 %v1128_v13 }
 0x42f   : > { %2280 = vpow2.f32 %v1130_v14 }
 0x43b   : > { %v2279_v15 = vpop.eup %2278 }
 0x43c   : > { %v2281_v16 = vpop.eup %2280  ;;  %v1132_v17 = vsel %vm820_vm0, %v2279_v15, 0.0 }
 0x43d   : > { %v1133_v18 = vsel %vm820_vm0, %v2281_v16, 0.0 }
 0x43e   : > { %v1134_v19 = vadd.f32 %v1133_v18, %v1132_v17 }
 0x440   : > { %v1135_v20 = vrot.slane %v1134_v19, 4 }
 0x442   : > { %v1136_v21 = vadd.f32 %v1135_v20, %v1134_v19 }
 0x444   : > { %v1137_v22 = vrot.slane %v1136_v21, 2 }
 0x446   : > { %v1138_v23 = vadd.f32 %v1137_v22, %v1136_v21 }
 0x448   : > { %v1139_v24 = vrot.slane %v1138_v23, 1 }
 0x44a   : > { %v1140_v25 = vadd.f32 %v1139_v24, %v1138_v23 }
 0x44c   : > { %2282 = vrcp.f32 %v1140_v25 }
 0x459   : > { %v2283_v26 = vpop.eup %2282 }
 0x45a   : > { %v1143_v30 = vmul.f32 %v2283_v26, %v2281_v16  ;;  %v1142_v31 = vmul.f32 %v2283_v26, %v2279_v15 }
 0x45c   : > { %2123 = vmatprep.subr.mxu1 %v1143_v30 }
 0x45d   : > { %2124 = vmatpush3.msra.mxu1 %v1143_v30 }
 0x45e   : > { %2125 = vmatprep.subr.mxu1 %v1142_v31 }
 0x45f   : > { %2126 = vmatpush3.msra.mxu1 %v1142_v31 }
 0x460   : > { %2128 = vmatmul.mubr.msk.f32.vlgmr.msra.gmra.mxu1 %vm820_vm0, %v2759_v27  ;;  %v1519_v27 = vld [vmem:[#allocation7 + $0x18] sm:$0xff] }
 0x461   : > { %2130 = vmatprep.mubr.msk.f32.mxu1 %vm820_vm0, %v2765_v28  ;;  %v1518_v28 = vld [vmem:[#allocation7 + $0x10] sm:$0xff]  ;;  %2169 = vmatprep.subr.mxu0 %v1519_v27 }
 0x464   : > { %2131 = vmatmul.mubr.msk.f32.gmra.mxu1 %vm820_vm0, %v2771_v29 }
 0x465   : > { %2155 = vmatprep.mubr.msk.f32.mxu1 %vm954_vm1, %v684_v32 }
 0x520   : > { %v2129_v33 = vpop.f32.mrf.mxu1 }
 0x522   : > { %v1222_v34 = vpop.f32.mrf.mxu1 }
 0x523   : > { %2141 = vmatprep.mubr.msk.f32.mxu0 %vm820_vm0, %v1222_v34 }
 0x524   : > { %v2132_v35 = vpop.f32.mrf.mxu1  ;;  %2142 = vmatmul.mubr.msk.f32.vlgmr.msra.gmra.mxu0 %vm820_vm0, %v2129_v33 }
 0x525   : > { %2170 = vmatpush3.msra.mxu0 %v1519_v27 }
 0x526   : > { %v1232_v36 = vpop.f32.mrf.mxu1  ;;  %2171 = vmatprep.subr.mxu0 %v1518_v28 }
 0x527   : > { %2144 = vmatprep.mubr.msk.f32.mxu0 %vm820_vm0, %v1232_v36  ;;  %2172 = vmatpush3.msra.mxu0 %v1518_v28 }
 0x528   : > { %2145 = vmatmul.mubr.msk.f32.gmra.mxu0 %vm820_vm0, %v2132_v35 }
 0x5e4   : > { %v2143_v29 = vpop.f32.mrf.mxu0 }
 0x5e5   : > { %v1339_v46 = vmul.f32 %v2143_v29, %v2799_v47  ;;  %v1516_v47 = vld [vmem:[#allocation7] sm:$0xff] }
 0x5e6   : > { %v1319_v37 = vpop.f32.mrf.mxu0 }
 0x5e7   : > { %v1338_v49 = vmul.f32 %v1319_v37, %v2802_v50  ;;  %v1612_v50 = vld [vmem:[#allocation7 + $0x38] sm:$0xff] }
 0x5e8   : > { %v2146_v38 = vpop.f32.mrf.mxu0 }
 0x5e9   : > { %v1341_v41 = vmul.f32 %v2146_v38, %v2794_v43  ;;  %v772_v43 = vadd.f32 %v1919_v48, %v2792_v40  ;;  %v777_v40 = vadd.f32 %v2790_v39, %v1919_v48  ;;  %v1610_v39 = vld [vmem:[#allocation7 + $0x28] sm:$0xff] }
 0x5ea   : > { %v1329_v42 = vpop.f32.mrf.mxu0 }
 0x5eb   : > { %v1340_v44 = vmul.f32 %v1329_v42, %v2796_v45  ;;  %2147 = vmatprep.subr.mxu1 %v1341_v41  ;;  %v1517_v45 = vld [vmem:[#allocation7 + $0x8] sm:$0xff] }
 0x5ec   : > { %2148 = vmatpush3.msra.mxu1 %v1341_v41  ;;  %2173 = vmatprep.subr.mxu0 %v1517_v45 }
 0x5ed   : > { %2149 = vmatprep.subr.mxu1 %v1340_v44  ;;  %2174 = vmatpush3.msra.mxu0 %v1517_v45 }
 0x5ee   : > { %2150 = vmatpush3.msra.mxu1 %v1340_v44  ;;  %2175 = vmatprep.subr.mxu0 %v1516_v47 }
 0x5ef   : > { %2151 = vmatprep.subr.mxu1 %v1339_v46  ;;  %2176 = vmatpush3.msra.mxu0 %v1516_v47 }
 0x5f0   : > { %2152 = vmatpush3.msra.mxu1 %v1339_v46  ;;  %2180 = vmatprep.subr.mxu0 %v1612_v50 }
 0x5f1   : > { %2153 = vmatprep.subr.mxu1 %v1338_v49 }
 0x5f2   : > { %2154 = vmatpush3.msra.mxu1 %v1338_v49 }
 0x5f3   : > { %2156 = vmatmul.mubr.msk.f32.vlgmr.msra.gmra.mxu1 %vm954_vm1, %v2812_v56  ;;  %2158 = vmatprep.subr.msk.mxu1 %vm954_vm1, %v1341_v41 }
 0x5f4   : > { %2159 = vmatpush3.xpose.msk.msra.mxu1 %vm954_vm1, %v1341_v41  ;;  %2166 = vmatprep.mubr.msk.f32.mxu1 %vm954_vm1, %v772_v43 }
 0x5f5   : > { %2160 = vmatprep.subr.msk.mxu1 %vm954_vm1, %v1340_v44 }
 0x5f8   : > { %2161 = vmatpush3.xpose.msk.msra.mxu1 %vm954_vm1, %v1340_v44 }
 0x5f9   : > { %2162 = vmatprep.subr.msk.mxu1 %vm954_vm1, %v1339_v46 }
 0x5fc   : > { %2163 = vmatpush3.xpose.msk.msra.mxu1 %vm954_vm1, %v1339_v46 }
 0x5fd   : > { %2164 = vmatprep.subr.msk.mxu1 %vm954_vm1, %v1338_v49 }
 0x600   : > { %2165 = vmatpush3.xpose.msk.msra.mxu1 %vm954_vm1, %v1338_v49 }
 0x603   : > { %2167 = vmatmul.mubr.msk.f32.vlgmr.msra.gmra.mxu1 %vm954_vm1, %v777_v40 }
 0x6b3   : > { %v2157_v51 = vpop.f32.mrf.mxu1 }
 0x6b5   : > { %v1414_v52 = vpop.f32.mrf.mxu1 }
 0x6b6   : > { %2177 = vmatprep.mubr.msk.f32.mxu0 %vm954_vm1, %v1414_v52 }
 0x6b7   : > { %2178 = vmatmul.mubr.msk.f32.vlgmr.msra.gmra.mxu0 %vm954_vm1, %v2157_v51 }
 0x6b8   : > { %2181 = vmatpush3.msra.mxu0 %v1612_v50 }
 0x6b9   : > { %2182 = vmatprep.subr.mxu0 %v1611_v53 }
 0x6ba   : > { %2183 = vmatpush3.msra.mxu0 %v1611_v53 }
 0x6bb   : > { %2184 = vmatprep.subr.mxu0 %v1610_v39 }
 0x6bc   : > { %2185 = vmatpush3.msra.mxu0 %v1610_v39 }
 0x6bd   : > { %2186 = vmatprep.subr.mxu0 %v1609_v54 }
 0x6be   : > { %2187 = vmatpush3.msra.mxu0 %v1609_v54 }
 0x6c3   : > { %v2168_v55 = vpop.f32.mrf.mxu1 }
 0x6c5   : > { %v1507_v56 = vpop.f32.mrf.mxu1 }
 0x6c6   : > { %2188 = vmatprep.mubr.msk.f32.mxu0 %vm954_vm1, %v1507_v56 }
 0x6c7   : > { %2189 = vmatmul.mubr.msk.f32.vlgmr.msra.gmra.mxu0 %vm954_vm1, %v2168_v55 }
 0x777   : > { %v2179_v58 = vpop.f32.mrf.mxu0 }
 0x778   : > { %v1605_v59 = vadd.f32 %v2179_v58, %v1948_v57 }
 0x779   : > { %v1599_v60 = vpop.f32.mrf.mxu0 }
 0x77a   : > { %v1709_v61 = vadd.f32 %v1605_v59, %v2737_v11  ;;  %v1600_v62 = vadd.f32 %v1948_v57, %v1599_v60 }
 0x77c   : > { %v1711_v63 = vmax.f32 %v1709_v61, 0.0  ;;  %v1708_v0 = vadd.f32 %v1600_v62, %v2730_v5 }
 0x77e   : > { %1713 = vst [vmem:[%s420_s19 + $0x8] sm:$0xff] %v1711_v63  ;;  %v1710_v1 = vmax.f32 %v1708_v0, 0.0 }
 0x780   : > { %1712 = vst [vmem:[%s420_s19] sm:$0xff] %v1710_v1 }
 0x781   : > { %2403 = shalt.err (!%p2400_p6)
}
 0x782   : > { %s2404_s21 = scalar_lea.hbm %s2884_s15, 256  ;;  %s2408_s17 = scalar_lea.hbm %s2978_s9, 512 }
 0x783   : > { %p2405_p4 = scmp.ne.s32.totalorder %s2884_s15, %s2404_s21  ;;  %p2409_p11 = scmp.lt.s32.totalorder %s2884_s15, %s2978_s9 }
 0x784   : > { %p2410_p5 = scmp.lt.s32.totalorder %s2408_s17, %s2404_s21 }
 0x785   : > { %p2406_p8 = pnand %p2405_p4, %p3005_p12 }
 0x786   : > { %p2411_p7 = por %p2410_p5, %p2409_p11 }
 0x787   : > { %p2407_p3 = pneg %p2406_p8 }
 0x789   : > { %p2412_p1 = pnand %p2411_p7, %p2407_p3 }
 0x78b   : > { %2415 = shalt.err (!%p2412_p1)
}
 0x78c   : > { %s2501_s28 = smov 128   ;;  %s2502_s20 = smov 8   ;;  %v1952_v5 = vld [vmem:[%s2974_s5 + $0x1] ss:$0 sm:$0xff]  ;;  %v2190_v11 = vpop.f32.mrf.mxu0 }
 0x78d   : > { %2206 = dma.vmem_to_hbm [thread:$0]  (%p3005_p12), %s2876_s26, 256, %s2884_s15, %s1720_s25, %s2501_s28, %s2501_s28, %s2502_s20   ;;  %v1699_v3 = vadd.f32 %v2190_v11, %v1952_v5 }
 0x78e   : > { %v1693_v4 = vpop.f32.mrf.mxu0  ;;  %s413_s21 = scalar_lea.vmem [#allocation10], %s2704_s6  ;;  %s2925_s25 = scalar_lea.hbm %s2977_s8, %s1965_s24 }
 0x78f   : > { %v1703_v6 = vadd.f32 %v1699_v3, %v2733_v10  ;;  %s1733_s19 = sshll.u32 %s413_s21, 4  ;;  %v1694_v7 = vadd.f32 %v1952_v5, %v1693_v4  ;;  %s1715_s6 = scalar_lea.sflag [#allocation4], %s2701_s4  ;;  %s2918_s19 = int_to_ptr.vmem [resolvable:$true] %s1733_s19 }
 0x790   : > { %s2416_s17 = scalar_lea.vmem %s2918_s19, 256  ;;  %s2503_s27 = smov [#allocation10]  }
 0x791   : > { %v1705_v8 = vmax.f32 %v1703_v6, 0.0  ;;  %v1702_v9 = vadd.f32 %v1694_v7, %v2725_v2  ;;  %p2417_p9 = scmp.ne.s32.totalorder %s2918_s19, %s2416_s17  ;;  %s2420_s23 = sshll.u32 %s2503_s27, 4  ;;  %s2421_s23 = int_to_ptr.vmem [resolvable:$false] %s2420_s23 }
 0x792   : > { %s2422_s18 = scalar_lea.vmem %s2421_s23, 512  ;;  %p2423_p2 = scmp.lt.s32.totalorder %s2918_s19, %s2421_s23 }
 0x793   : > { %1707 = vst [vmem:[%s413_s21 + $0x8] sm:$0xff] %v1705_v8  ;;  %v1704_v12 = vmax.f32 %v1702_v9, 0.0  ;;  %p2418_p13 = pnand %p2417_p9, %p3005_p12  ;;  %p2424_p10 = scmp.lt.s32.totalorder %s2422_s18, %s2416_s17 }
 0x795   : > { %1706 = vst [vmem:[%s413_s21] sm:$0xff] %v1704_v12  ;;  %p2419_p0 = pneg %p2418_p13  ;;  %p2425_p6 = por %p2424_p10, %p2423_p2 }
 0x797   : > { %p2426_p4 = pnand %p2425_p6, %p2419_p0 }
 0x799   : > { %2429 = shalt.err (!%p2426_p4)
}
 0x79a   : > { %s2430_s13 = scalar_lea.hbm %s2925_s25, 256  ;;  %s2434_s2 = scalar_lea.hbm %s2977_s8, 512 }
 0x79b   : > { %p2431_p8 = scmp.ne.s32.totalorder %s2925_s25, %s2430_s13  ;;  %p2435_p5 = scmp.lt.s32.totalorder %s2925_s25, %s2977_s8 }
 0x79c   : > { %p2436_p7 = scmp.lt.s32.totalorder %s2434_s2, %s2430_s13 }
 0x79d   : > { %p2432_p3 = pnand %p2431_p8, %p3005_p12 }
 0x79e   : > { %p2437_p1 = por %p2436_p7, %p2435_p5 }
 0x79f   : > { %p2433_p11 = pneg %p2432_p3 }
 0x7a1   : > { %p2438_p9 = pnand %p2437_p1, %p2433_p11 }
 0x7a3   : > { %2441 = shalt.err (!%p2438_p9)
}
 0x7a4   : > { %2205 = dma.vmem_to_hbm [thread:$0]  (%p3005_p12), %s2918_s19, 256, %s2925_s25, %s1715_s6, %s2501_s28, %s2501_s28, %s2502_s20  }
 0x7a5 PF: > { %s1764_s15 = sand.u32 1, %s2480_s30   ;;  %p3006_p13 = scmp.ne.s32.totalorder %s2989_s16, 0 }
 0x7a6   : > { %p3007_p0 = scmp.ge.s32.totalorder %s2492_s12, 2  ;;  %s1765_s17 = scalar_lea.sflag [#allocation4], %s1764_s15 }
 0x7a8   : > { %p2224_p2 = pnand %p3007_p0, %p3006_p13 }
 0x7aa   : > { %p2225_p10 = pneg %p2224_p2 }
 0x7ac   : > { %2471 = dma.done.wait (%p2225_p10), %s1765_s17, 256  }
 0x7ad   : > { %2473 = vsyncadd (%p2225_p10), %s1765_s17, 4294967040  ;;  %s1774_s27 = scalar_lea.sflag [#allocation12], %s1764_s15 }
 0x7ae   : > { %2475 = dma.done.wait (%p2225_p10), %s1774_s27, 256  }
 0x7af   : > { %2477 = vsyncadd (%p2225_p10), %s1774_s27, 4294967040  ;;  %p28_p12 = scmp.ge.s32.totalorder %s2643_s22, 4   ;;  %s3008_s30 = smov %s2484_s10 }
 0x7b0   : > { %s3009_s10 = smov %s2488_s11  ;;  %s3010_s11 = smov %s2653_s29 }
 0x7b1   : > { %s3011_s12 = smov %s2643_s22  ;;  %30 = sbr.rel (!%p28_p12) target bundleno = 13 (0xd), region = 137 }
 0x7b6   :  { %1779 = vsyncpa [#allocation3], 1 }
 0x7b7   :  { %1781 = vsyncpa [#allocation3 + $0x1], 1 }
 0x7b8   :  { %1782 = vsyncpa [#allocation6], 1 }
 0x7b9   :  { %1783 = vsyncpa [#allocation9], 1 }
 0x7ba   :  { %1784 = vsyncpa [#allocation4], 1 }
 0x7bb   :  { %1786 = vsyncpa [#allocation4 + $0x1], 1 }
 0x7bc   :  { %1787 = vsyncpa [#allocation12], 1 }
 0x7bd   :  { %1789 = vsyncpa [#allocation12 + $0x1], 1 }

</bundles_post_ra>
